<compile_context>
chip_gen: v6e
topology: v6e:2x2x1
jax: 0.10.0
libtpu: 0.0.40
codegen_flags: <defaults>
</compile_context>

<pallas_src>
import functools

import jax
import jax.numpy as jnp
from jax import lax
from jax.experimental import pallas as pl
from jax.experimental.pallas import tpu as pltpu


# --------------------------------------------------------------------------
# Hardware-aware helpers
# --------------------------------------------------------------------------
def _vmem_capacity_bytes():
    try:
        info = pltpu.get_tpu_info()
        cap = getattr(info, "vmem_capacity_bytes", None)
        if cap:
            return int(cap)
    except Exception:
        pass
    return 64 << 20  # conservative default (v7x per-TC VMEM)


def _mxu_operand_dtype():
    """bf16 operands on v6e/v7x (native bf16 VALU); f32 on v5e."""
    try:
        kind = jax.devices()[0].device_kind.lower()
    except Exception:
        return jnp.bfloat16
    if "v5 lite" in kind or "v5e" in kind or "v5litepod" in kind:
        return jnp.float32
    return jnp.bfloat16


# --------------------------------------------------------------------------
# Standard conv (fused offset_conv + modulator_conv): im2col + matmul.
# --------------------------------------------------------------------------
def _conv_matmul_kernel(p_ref, w_ref, b_ref, o_ref):
    # p_ref: (1, Cin*K*K, T) bf16   w_ref: (Cout, Cin*K*K) bf16   b_ref: (Cout, 1) f32
    o_ref[0] = (
        jnp.dot(w_ref[...], p_ref[0], preferred_element_type=jnp.float32)
        + b_ref[...]
    )


def _im2col(x, ksize, stride, pad):
    B, C, H, W = x.shape
    kh, kw = ksize
    sh, sw = stride
    Ho = (H + 2 * pad - kh) // sh + 1
    Wo = (W + 2 * pad - kw) // sw + 1
    xp = jnp.pad(x, ((0, 0), (0, 0), (pad, pad), (pad, pad)))
    cols = []
    for i in range(kh):
        for j in range(kw):
            cols.append(xp[:, :, i:i + Ho * sh:sh, j:j + Wo * sw:sw])
    patches = jnp.stack(cols, axis=2)                 # (B, C, K*K, Ho, Wo)
    return patches.reshape(B, C * kh * kw, Ho * Wo), Ho, Wo


def conv2d_pallas(x, weight, bias, stride, pad):
    B, Cin, H, W = x.shape
    Cout, _, kh, kw = weight.shape
    # im2col on bf16 input: halves the patches HBM blow-up.
    # TODO(synk): an in-kernel im2col (or full fusion into the deformable
    # kernel, where the x block is already VMEM-resident) would remove the
    # remaining K*K-fold patches traffic entirely.
    patches, Ho, Wo = _im2col(x.astype(jnp.bfloat16), (kh, kw), stride, pad)
    CKK = Cin * kh * kw
    HWo = Ho * Wo

    w2 = weight.reshape(Cout, CKK).astype(jnp.bfloat16)
    b2 = bias.reshape(Cout, 1).astype(jnp.float32)

    tile = HWo if HWo <= 1024 else 1024               # multiple of 128 when tiled
    nt = pl.cdiv(HWo, tile)
    vmem_limit = max(32 << 20, int(_vmem_capacity_bytes() * 0.85))

    out = pl.pallas_call(
        _conv_matmul_kernel,
        out_shape=jax.ShapeDtypeStruct((B, Cout, HWo), jnp.float32),
        grid_spec=pltpu.PrefetchScalarGridSpec(
            num_scalar_prefetch=0,
            grid=(B, nt),
            in_specs=[
                pl.BlockSpec((1, CKK, tile), lambda b, t: (b, 0, t)),
                pl.BlockSpec((Cout, CKK), lambda b, t: (0, 0)),
                pl.BlockSpec((Cout, 1), lambda b, t: (0, 0)),
            ],
            out_specs=pl.BlockSpec((1, Cout, tile), lambda b, t: (b, 0, t)),
        ),
        compiler_params=pltpu.CompilerParams(
            dimension_semantics=("parallel", "parallel"),
            vmem_limit_bytes=vmem_limit),
    )(patches, w2, b2)
    return out.reshape(B, Cout, Ho, Wo)


# --------------------------------------------------------------------------
# Modulated deformable conv kernel (torchvision deform_conv2d semantics).
# --------------------------------------------------------------------------
def _deform_conv_kernel(x_ref, offy_ref, offx_ref, mod_ref, w_ref, o_ref,
                        acc_ref, *, H, W_p, Wo, KH, KW, sh, sw, pad, tile,
                        s_dtype):
    T = tile
    KK = KH * KW
    Cin_p = x_ref.shape[1]

    x_b = x_ref[0]                                    # (Cin_p, H*W_p) mxu dtype
    # Hoisted modulator: one wide EUP pass for all taps.
    mod_all = 2.0 * jax.nn.sigmoid(mod_ref[0])        # (K*K, T) f32

    # Global output-pixel coordinates of this lane tile.
    q = lax.broadcasted_iota(jnp.int32, (1, T), 1) + pl.program_id(1) * T
    base_y = ((q // Wo) * sh - pad).astype(jnp.float32)   # (1, T)
    base_x = ((q % Wo) * sw - pad).astype(jnp.float32)    # (1, T)

    # Hoisted sample coordinates for all taps: two vectorized (K*K, T) adds.
    kidx = lax.broadcasted_iota(jnp.int32, (KK, 1), 0)
    ky = (kidx // KW).astype(jnp.float32)
    kx = (kidx % KW).astype(jnp.float32)
    py_all = base_y + ky + offy_ref[0]                # (K*K, T) f32
    px_all = base_x + kx + offx_ref[0]                # (K*K, T) f32

    row_f = lax.broadcasted_iota(jnp.int32, (H, 1), 0).astype(jnp.float32)
    col_f = lax.broadcasted_iota(jnp.int32, (W_p, 1), 0).astype(jnp.float32)

    # Static unroll over the K*K taps. relu(1-|r-p|) is exactly torchvision's
    # bilinear weight including the zero contribution outside the border; the
    # padded columns of x are zero so W_p padding changes nothing.
    for k in range(KK):
        py = py_all[k:k + 1, :]                       # (1, T)
        px = px_all[k:k + 1, :]
        # Cast the small factors BEFORE the big outer product so the dominant
        # (H*W_p, T) multiply is packed in the MXU operand dtype.
        ay = (jnp.maximum(1.0 - jnp.abs(row_f - py), 0.0)
              * mod_all[k:k + 1, :]).astype(s_dtype)  # (H, T)
        ax = jnp.maximum(1.0 - jnp.abs(col_f - px), 0.0).astype(s_dtype)  # (W_p, T)
        s = (ay[:, None, :] * ax[None, :, :]).reshape(H * W_p, T)
        acc_ref[k * Cin_p:(k + 1) * Cin_p, :] = jnp.dot(
            x_b, s, preferred_element_type=jnp.float32).astype(acc_ref.dtype)

    # ONE (Cout, K*K*Cin_p) @ (K*K*Cin_p, T) matmul over the stacked taps.
    o_ref[0] = jnp.dot(w_ref[...], acc_ref[...],
                       preferred_element_type=jnp.float32)


def deform_conv2d_pallas(x, offset, modulator_raw, weight, stride, pad):
    B, Cin, H, W = x.shape
    Cout, _, KH, KW = weight.shape
    _, _, Ho, Wo = offset.shape
    sh, sw = stride
    KK = KH * KW
    HWo = Ho * Wo

    mxu_dtype = _mxu_operand_dtype()
    sbytes = jnp.dtype(mxu_dtype).itemsize

    # Pad W so the in-kernel (H, W_p, T) -> (H*W_p, T) reshape is a pure
    # relayout-free view (sublane tile: 16 for bf16, 8 for f32).
    w_mult = 16 if sbytes == 2 else 8
    W_p = max(w_mult, ((W + w_mult - 1) // w_mult) * w_mult)
    HWin = H * W_p

    # Pad Cin to a multiple of 8 so per-tap sampled blocks stay sublane-aligned
    # when stacked (zero channels / zero weight columns contribute nothing).
    Cin_p = max(8, ((Cin + 7) // 8) * 8)

    x_sp = x
    if W_p != W:
        x_sp = jnp.pad(x, ((0, 0), (0, 0), (0, 0), (0, W_p - W)))
    x_flat = x_sp.reshape(B, Cin, HWin)
    if Cin_p != Cin:
        x_flat = jnp.pad(x_flat, ((0, 0), (0, Cin_p - Cin), (0, 0)))
    x_flat = x_flat.astype(mxu_dtype)

    # torchvision offset layout: channel 2k = dy_k, 2k+1 = dx_k. Split in the
    # wrapper so the kernel never does strided sublane slicing.
    off = offset.reshape(B, KK, 2, HWo).astype(jnp.float32)   # coords stay f32
    off_y = off[:, :, 0]                              # (B, K*K, HWo)
    off_x = off[:, :, 1]
    mod_flat = modulator_raw.reshape(B, KK, HWo).astype(jnp.float32)

    # (Cout, Cin, KH, KW) -> (Cout, K*K, Cin_p) -> (Cout, K*K*Cin_p), tap-major
    w_r = weight.reshape(Cout, Cin, KK).transpose(0, 2, 1)
    if Cin_p != Cin:
        w_r = jnp.pad(w_r, ((0, 0), (0, 0), (0, Cin_p - Cin)))
    w2 = w_r.reshape(Cout, KK * Cin_p).astype(mxu_dtype)

    # ---- VMEM-aware tile selection ------------------------------------
    vmem_cap = _vmem_capacity_bytes()
    budget = int(vmem_cap * 0.70)
    vmem_limit = max(32 << 20, int(vmem_cap * 0.85))
    # resident / per-lane byte estimates (x double-buffered, S, scratch, blocks)
    fixed = 2 * Cin_p * HWin * sbytes + Cout * KK * Cin_p * sbytes
    per_lane = int(1.25 * (HWin * sbytes                    # S
                           + (H + W_p) * (4 + sbytes)       # ay/ax (+casts)
                           + KK * Cin_p * sbytes            # acc scratch
                           + Cin_p * 4                      # per-tap dot result
                           + 3 * KK * 4 * 2                 # offy/offx/mod (dbl buf)
                           + 2 * KK * 4                     # py_all/px_all
                           + Cout * 4 * 2))                 # out (dbl buf)
    avail = max(budget - fixed, 128 * per_lane)
    tile = max(128, min(1024, (int(avail // per_lane) // 128) * 128))
    if tile >= HWo:
        tile = HWo
        if B == 1 and HWo > 128:
            # v7x megacore: expose >=2 independent grid steps for the 2 TCs.
            tile = max(128, ((HWo // 2) // 128) * 128)
    nt = pl.cdiv(HWo, tile)

    kernel = functools.partial(
        _deform_conv_kernel, H=H, W_p=W_p, Wo=Wo, KH=KH, KW=KW,
        sh=sh, sw=sw, pad=pad, tile=tile, s_dtype=mxu_dtype)

    out = pl.pallas_call(
        kernel,
        out_shape=jax.ShapeDtypeStruct((B, Cout, HWo), jnp.float32),
        grid_spec=pltpu.PrefetchScalarGridSpec(
            num_scalar_prefetch=0,
            grid=(B, nt),
            in_specs=[
                pl.BlockSpec((1, Cin_p, HWin), lambda b, t: (b, 0, 0)),
                pl.BlockSpec((1, KK, tile), lambda b, t: (b, 0, t)),
                pl.BlockSpec((1, KK, tile), lambda b, t: (b, 0, t)),
                pl.BlockSpec((1, KK, tile), lambda b, t: (b, 0, t)),
                pl.BlockSpec((Cout, KK * Cin_p), lambda b, t: (0, 0)),
            ],
            out_specs=pl.BlockSpec((1, Cout, tile), lambda b, t: (b, 0, t)),
            scratch_shapes=[pltpu.VMEM((KK * Cin_p, tile), mxu_dtype)],
        ),
        compiler_params=pltpu.CompilerParams(
            dimension_semantics=("parallel", "parallel"),
            vmem_limit_bytes=vmem_limit),
    )(x_flat, off_y, off_x, mod_flat, w2)
    return out.reshape(B, Cout, Ho, Wo)


# --------------------------------------------------------------------------
# Module equivalent of models/patch.py::DeformableConv2d
# --------------------------------------------------------------------------
class DeformableConv2dPallas:
    def __init__(self, in_channels, out_channels, kernel_size=3, stride=1,
                 padding=1, bias=False, *, key):
        ks = kernel_size if isinstance(kernel_size, tuple) else (kernel_size, kernel_size)
        self.kernel_size = ks
        self.stride = stride if isinstance(stride, tuple) else (stride, stride)
        self.padding = padding
        kk = ks[0] * ks[1]

        # offset_conv / modulator_conv are zero-initialized in the PyTorch module
        self.offset_w = jnp.zeros((2 * kk, in_channels, ks[0], ks[1]), jnp.float32)
        self.offset_b = jnp.zeros((2 * kk,), jnp.float32)
        self.mod_w = jnp.zeros((kk, in_channels, ks[0], ks[1]), jnp.float32)
        self.mod_b = jnp.zeros((kk,), jnp.float32)

        # regular_conv: deterministic kaiming-uniform-style init
        fan_in = in_channels * kk
        bound = 1.0 / (fan_in ** 0.5)
        self.weight = jax.random.uniform(
            key, (out_channels, in_channels, ks[0], ks[1]),
            minval=-bound, maxval=bound, dtype=jnp.float32)
        # TODO(synk): module default is bias=False (regular_conv.bias is None);
        # bias=True path is not implemented.
        self.bias = None

    def __call__(self, x):
        kk = self.kernel_size[0] * self.kernel_size[1]
        # Fused offset + modulator conv: one im2col, one Pallas matmul call.
        w_cat = jnp.concatenate([self.offset_w, self.mod_w], axis=0)  # (3*K*K, Cin, kh, kw)
        b_cat = jnp.concatenate([self.offset_b, self.mod_b], axis=0)
        om = conv2d_pallas(x, w_cat, b_cat, self.stride, self.padding)
        offset = om[:, :2 * kk]
        mod_raw = om[:, 2 * kk:]
        # 2.0 * sigmoid(modulator) is applied inside the deformable kernel.
        return deform_conv2d_pallas(x, offset, mod_raw, self.weight,
                                    self.stride, self.padding)


if __name__ == "__main__":
    key = jax.random.PRNGKey(0)
    kx, kwt = jax.random.split(key)

    B, Cin, H, W = 2, 4, 16, 16
    Cout = 8
    x = jax.random.normal(kx, (B, Cin, H, W), dtype=jnp.float32)

    layer = DeformableConv2dPallas(Cin, Cout, kernel_size=3, stride=1,
                                   padding=1, bias=False, key=kwt)
    y = jax.block_until_ready(layer(x))
    assert y.shape == (B, Cout, H, W), y.shape

    # With zero-initialized offset/modulator convs, offsets are 0 and the mask
    # is exactly 1.0, so deform_conv2d reduces to a plain conv. The kernel uses
    # generation-dependent MXU operand dtype, so compare against a conv over
    # inputs rounded to that dtype.
    md = _mxu_operand_dtype()
    xb = x.astype(md).astype(jnp.float32)
    wb = layer.weight.astype(md).astype(jnp.float32)
    ref = lax.conv_general_dilated(
        xb, wb, window_strides=layer.stride,
        padding=[(layer.padding, layer.padding)] * 2,
        dimension_numbers=("NCHW", "OIHW", "NCHW"))
    err = float(jnp.max(jnp.abs(y - ref)))
    assert err < 1e-2, f"max abs err {err}"

    print("KERNEL_OK")
</pallas_src>

<mosaic_0001>
module attributes {stable_mosaic.version = 11 : i64} {
  func.func @_conv_matmul_kernel(%arg0: i32, %arg1: i32, %arg2: memref<1x36x256xbf16, #tpu.memory_space<vmem>>, %arg3: memref<27x36xbf16, #tpu.memory_space<vmem>>, %arg4: memref<27x1xf32, #tpu.memory_space<vmem>>, %arg5: memref<1x27x256xf32, #tpu.memory_space<vmem>>) attributes {dimension_semantics = [#tpu.dimension_semantics<parallel>, #tpu.dimension_semantics<parallel>], iteration_bounds = array<i64: 2, 1>, scalar_prefetch = 0 : i64, scratch_operands = 0 : i64, tpu.core_type = #tpu.core_type<tc>, window_params = [{transform_indices = @transform_0, window_bounds = array<i64: 1, 36, 256>}, {pipeline_mode = #tpu.pipeline_mode<synchronous>, transform_indices = @transform_1, window_bounds = array<i64: 27, 36>}, {pipeline_mode = #tpu.pipeline_mode<synchronous>, transform_indices = @transform_2, window_bounds = array<i64: 27, 1>}, {transform_indices = @transform_3, window_bounds = array<i64: 1, 27, 256>}]} {
    %c0 = arith.constant 0 : index
    %c0_0 = arith.constant 0 : index
    %0 = vector.load %arg3[%c0, %c0_0] : memref<27x36xbf16, #tpu.memory_space<vmem>>, vector<27x36xbf16>
    %c0_1 = arith.constant 0 : index
    %c0_2 = arith.constant 0 : index
    %c0_3 = arith.constant 0 : index
    %1 = vector.load %arg2[%c0_1, %c0_2, %c0_3] : memref<1x36x256xbf16, #tpu.memory_space<vmem>>, vector<1x36x256xbf16>
    %2 = vector.shape_cast %1 : vector<1x36x256xbf16> to vector<36x256xbf16>
    %cst = arith.constant dense<0.000000e+00> : vector<27x256xf32>
    %3 = tpu.matmul %0, %2, %cst {dimension_numbers = #tpu.dot_dimension_numbers<[1], [0], [0], [1], [0, 0, 1, 1], [], []>} : vector<27x36xbf16>, vector<36x256xbf16>, vector<27x256xf32> -> vector<27x256xf32>
    %c0_4 = arith.constant 0 : index
    %c0_5 = arith.constant 0 : index
    %4 = vector.load %arg4[%c0_4, %c0_5] : memref<27x1xf32, #tpu.memory_space<vmem>>, vector<27x1xf32>
    %5 = vector.broadcast %4 : vector<27x1xf32> to vector<27x256xf32>
    %6 = arith.addf %3, %5 : vector<27x256xf32>
    %c0_6 = arith.constant 0 : index
    %c0_7 = arith.constant 0 : index
    %c0_8 = arith.constant 0 : index
    %7 = vector.load %arg5[%c0_6, %c0_7, %c0_8] : memref<1x27x256xf32, #tpu.memory_space<vmem>>, vector<1x27x256xf32>
    %8 = vector.shape_cast %7 : vector<1x27x256xf32> to vector<27x256xf32>
    %9 = vector.shape_cast %6 : vector<27x256xf32> to vector<1x27x256xf32>
    tpu.vector_store %arg5[%c0_6, %c0_7, %c0_8], %9 {strides = array<i32>} : memref<1x27x256xf32, #tpu.memory_space<vmem>>, vector<1x27x256xf32>,
    return
  }
  func.func @transform_0(%arg0: i32, %arg1: i32) -> (i32, i32, i32) {
    %c0_i32 = arith.constant 0 : i32
    %c0_i32_0 = arith.constant 0 : i32
    return %arg0, %c0_i32, %arg1 : i32, i32, i32
  }
  func.func @transform_1(%arg0: i32, %arg1: i32) -> (i32, i32) {
    %c0_i32 = arith.constant 0 : i32
    %c0_i32_0 = arith.constant 0 : i32
    %c0_i32_1 = arith.constant 0 : i32
    return %c0_i32, %c0_i32_0 : i32, i32
  }
  func.func @transform_2(%arg0: i32, %arg1: i32) -> (i32, i32) {
    %c0_i32 = arith.constant 0 : i32
    %c0_i32_0 = arith.constant 0 : i32
    %c0_i32_1 = arith.constant 0 : i32
    return %c0_i32, %c0_i32_0 : i32, i32
  }
  func.func @transform_3(%arg0: i32, %arg1: i32) -> (i32, i32, i32) {
    %c0_i32 = arith.constant 0 : i32
    %c0_i32_0 = arith.constant 0 : i32
    return %arg0, %c0_i32, %arg1 : i32, i32, i32
  }
}

</mosaic_0001>

<bundles_post_ra>
// kernel: tpu_custom_call.1
= control target key start
LH: loop header
LB: loop body
LE: loop exit
PB: predicated region body
PF: predicated region fallthrough
CT: control target
= control target key end

     0   :  { %s552_s12 = smov 0   ;;  %s554_s13 = smov 0   ;;  %s607_s0 = inlined_call_operand.vmem [shape: bf16[2,36,256], index: 0, kind: input, shape index: {}]   ;;  %s608_s1 = inlined_call_operand.vmem [shape: bf16[27,36], index: 1, kind: input, shape index: {}]   ;;  %s609_s2 = inlined_call_operand.vmem [shape: f32[27,1], index: 2, kind: input, shape index: {}]   ;;  %s610_s3 = inlined_call_operand.vmem [shape: f32[2,27,256], index: 3, kind: output, shape index: {}]  }
   0x1   :  { %s556_s14 = smov 0  }
   0x2 LB: > { %s25_s15 = sadd.s32 1, %s525_s13  ;;  %p445_p0 = scmp.ge.s32.totalorder %s529_s14, 1  ;;  %s529_s14 = sphi %s556_s14, %s13_s14   ;;  %s525_s13 = sphi %s554_s13, %s612_s13   ;;  %s521_s12 = sphi %s552_s12, %s611_s12  }
   0x3   : > { %p27_p1 = scmp.ge.s32.totalorder %s25_s15, 2  ;;  %p158_p2 = scmp.lt.s32.totalorder %s529_s14, 3 }
   0x5   : > { %s614_s15 = smov (%p27_p1, %s25_s15), 0  ;;  %p159_p3 = pnand %p445_p0, %p158_p2 }
   0x6   : > { %p191_p4 = scmp.lt.s32.totalorder (!%p159_p3), %s521_s12, 1 }
   0x7   : > { %162 = sbr.rel (%p159_p3) target bundleno = 234 (0xea), region = 32 }
   0xc   : > { %v531_v0 = vmov 0   ;;  %v222_v1 = vld [vmem:[%s609_s2 + $0x10] sm:$0xff]  ;;  %s616_s12 = smov (!%p191_p4, %s521_s12), 1  ;;  %v220_v2 = vld [vmem:[%s609_s2] sm:$0xff]  ;;  %v223_v3 = vld [vmem:[%s609_s2 + $0x18] sm:$0x7] }
   0xd   : > { %325 = vmatprep.mubr.bf16.mxu0 %v531_v0  ;;  %335 = vmatprep.mubr.bf16.mxu1 %v531_v0  ;;  %s469_s20 = smul.u32 40, %s616_s12  ;;  %v221_v4 = vld [vmem:[%s609_s2 + $0x8] sm:$0xff]  ;;  %vm286_vm0 = vcmask 1041408   ;;  %v505_v13 = vld [vmem:[%s608_s1] sm:$0xff]   ;;  %vm279_vm1 = vcmask 293888   ;;  %s462_s5 = sshll.u32 %s616_s12, 6 }
   0xe   : > { %496 = vset.pattern.permute.xlu1 %v531_v0  ;;  %495 = vset.pattern.permute.xlu0 %v531_v0  ;;  %v506_v14 = vld [vmem:[%s608_s1 + $0x8] sm:$0x3f]   ;;  %s208_s8 = scalar_lea.vmem %s610_s3, %s462_s5 }
   0xf   : > { %236 = vperm.xlu1 %496, %v222_v1   ;;  %226 = vperm.xlu0 %495, %v220_v2   ;;  %s198_s27 = scalar_lea.vmem %s607_s0, %s469_s20 }
  0x10   : > { %v219_v5 = vld [vmem:[%s198_s27 + $0x20] sm:$0x33]  ;;  %v499_v8 = vld [vmem:[%s198_s27 + $0x14] ss:$8 sps:$4 sm:$0xff]   ;;  %v501_v10 = vld [vmem:[%s198_s27 + $0x10] ss:$8 sps:$4 sm:$0xff]  }
  0x11   : > { %v456_v6 = vcombine.high %v219_v5, %v219_v5  ;;  %v455_v7 = vcombine.low %v219_v5, %v219_v5  ;;  %v502_v11 = vld [vmem:[%s198_s27 + $0x4] ss:$8 sps:$4 sm:$0xff]   ;;  %v504_v12 = vld [vmem:[%s198_s27] ss:$8 sps:$4 sm:$0xff]  }
  0x13   : > { %241 = vperm.xlu1 %496, %v223_v3   ;;  %231 = vperm.xlu0 %495, %v221_v4   ;;  %v288_v9 = vsel %vm286_vm0, %v455_v7, 0 }
  0x14   : > { %457 = vmatprep.subr.msk.bf16.mxu0 %vm286_vm0, %v456_v6  ;;  %463 = vmatprep.subr.msk.bf16.mxu1 %vm286_vm0, %v456_v6 }
  0x15   : > { %304 = vmatpush1.bf16.msra.mxu0 %v288_v9  ;;  %466 = vmatpush1.bf16.msra.mxu1 %v288_v9 }
  0x16   : > { %305 = vmatprep.subr.bf16.mxu0 %v499_v8  ;;  %464 = vmatprep.subr.bf16.mxu1 %v499_v8 }
  0x19   : > { %306 = vmatpush1.bf16.msra.mxu0 %v501_v10  ;;  %467 = vmatpush1.bf16.msra.mxu1 %v501_v10 }
  0x1a   : > { %307 = vmatprep.subr.bf16.mxu0 %v502_v11  ;;  %465 = vmatprep.subr.bf16.mxu1 %v502_v11 }
  0x1d   : > { %308 = vmatpush1.bf16.msra.mxu0 %v504_v12  ;;  %468 = vmatpush1.bf16.msra.mxu1 %v504_v12 }
  0x20   : > { %458 = vmatmul.mubr.msk.bf16.vlgmr.msra.gmra.mxu0 %vm279_vm1, %v505_v13  ;;  %459 = vmatmul.mubr.msk.bf16.vlgmr.msra.gmra.mxu1 %vm279_vm1, %v506_v14 }
  0x8a   : > { %v237_v15 = vpop.permute.xlu1 %236  ;;  %v227_v16 = vpop.permute.xlu0 %226 }
  0x8e   : > { %v242_v23 = vpop.permute.xlu1 %241  ;;  %v232_v24 = vpop.permute.xlu0 %231 }
  0xe0   : > { %v327_v17 = vpop.f32.mrf.mxu0  ;;  %v337_v18 = vpop.f32.mrf.mxu1 }
  0xe1   : > { %v328_v19 = vadd.f32 %v327_v17, %v227_v16  ;;  %v338_v20 = vadd.f32 %v337_v18, %v237_v15 }
  0xe2   : > { %v329_v21 = vpop.f32.mrf.mxu0  ;;  %v339_v22 = vpop.f32.mrf.mxu1 }
  0xe3   : > { %346 = vst [vmem:[%s208_s8] sm:$0xff] %v328_v19  ;;  %350 = vst [vmem:[%s208_s8 + $0x20] sm:$0xff] %v338_v20  ;;  %v330_v25 = vadd.f32 %v329_v21, %v227_v16  ;;  %v340_v26 = vadd.f32 %v339_v22, %v237_v15 }
  0xe4   : > { %v331_v27 = vpop.f32.mrf.mxu0  ;;  %v341_v28 = vpop.f32.mrf.mxu1 }
  0xe5   : > { %347 = vst [vmem:[%s208_s8 + $0x8] sm:$0xff] %v330_v25  ;;  %351 = vst [vmem:[%s208_s8 + $0x28] sm:$0xff] %v340_v26  ;;  %v332_v29 = vadd.f32 %v331_v27, %v232_v24  ;;  %v342_v30 = vadd.f32 %v341_v28, %v242_v23 }
  0xe6   : > { %v333_v31 = vpop.f32.mrf.mxu0  ;;  %v343_v32 = vpop.f32.mrf.mxu1 }
  0xe7   : > { %348 = vst [vmem:[%s208_s8 + $0x10] sm:$0xff] %v332_v29  ;;  %352 = vst [vmem:[%s208_s8 + $0x30] sm:$0x7] %v342_v30  ;;  %v334_v33 = vadd.f32 %v333_v31, %v232_v24  ;;  %v344_v34 = vadd.f32 %v343_v32, %v242_v23 }
  0xe9   : > { %349 = vst [vmem:[%s208_s8 + $0x18] sm:$0xff] %v334_v33  ;;  %353 = vst [vmem:[%s208_s8 + $0x38] sm:$0x7] %v344_v34 }
  0xea PF: > { %s13_s14 = sadd.s32 1, %s529_s14   ;;  %s611_s12 = smov %s525_s13 }
  0xeb   : > { %p10_p5 = scmp.ge.s32.totalorder %s13_s14, 4   ;;  %s612_s13 = smov %s614_s15 }
  0xed   :  { %12 = sbr.rel (!%p10_p5) target bundleno = 2 (0x2), region = 62 }

</bundles_post_ra>
